<compile_context>
chip_gen: v7x
topology: tpu7x:2x2x1
jax: 0.10.0
libtpu: 0.0.40
codegen_flags: <defaults>
</compile_context>

<pallas_src>
from functools import partial

import jax
import jax.numpy as jnp
from jax.experimental import pallas as pl
from jax.experimental.pallas import tpu as pltpu

EPS = 1e-6


def _layernorm(x, alpha, bias, *, in_kernel=False):
    # PyTorch: alpha * (x - x.mean(-1)) / (x.std(-1, unbiased=True) + eps) + bias
    mean = jnp.mean(x, axis=-1, keepdims=True)
    var = jnp.sum((x - mean) ** 2, axis=-1, keepdims=True) / (x.shape[-1] - 1)
    denom = jnp.sqrt(var) + EPS
    if in_kernel:
        inv = pl.reciprocal(denom, approx=True)   # EUP slot, frees VALU
    else:
        inv = 1.0 / denom
    return alpha * (x - mean) * inv + bias


# ---------------------------------------------------------------------------
# Fused Pallas kernel: grid = (batch, layer); layer axis is the reduction axis.
# ---------------------------------------------------------------------------
def decoder_stack_kernel(x_ref, maskb_ref,
                         n1a_ref, n1b_ref,
                         wqkv_ref, bqkv_ref,
                         wo_ref, bo_ref,
                         n2a_ref, n2b_ref,
                         w1_ref, b1_ref, w2_ref, b2_ref,
                         nfa_ref, nfb_ref,
                         o_ref, x_acc, *, heads):
    layer = pl.program_id(1)
    n_layers = pl.num_programs(1)
    bf16 = jnp.bfloat16

    # --- load the residual stream into the VMEM accumulator on the first layer ---
    @pl.when(layer == 0)
    def _():
        x_acc[...] = x_ref[...].astype(jnp.float32)

    x = x_acc[...]                                  # (S, D) f32, resident across layers
    S, D = x.shape
    dk = D // heads
    scale = 1.0 / (dk ** 0.5)
    mask_bias = maskb_ref[...]                      # (S, S) additive bias (0 or -1e9)

    # ---- self-attention sub-block (pre-norm, residual) ----
    x2 = _layernorm(x, n1a_ref[...], n1b_ref[...], in_kernel=True)
    qkv = jnp.dot(x2.astype(bf16), wqkv_ref[...],
                  preferred_element_type=jnp.float32) + bqkv_ref[...]      # (S, 3D) f32

    # fold the 1/sqrt(dk) scale into q (cheaper than scaling (H,S,S) scores)
    q = qkv[:, :D] * scale
    # pack heads to the leading (batch) dim, then use single batched contractions
    qh = jnp.stack([q[:, h * dk:(h + 1) * dk] for h in range(heads)], 0).astype(bf16)
    kh = jnp.stack([qkv[:, D + h * dk:D + (h + 1) * dk]
                    for h in range(heads)], 0).astype(bf16)
    vh = jnp.stack([qkv[:, 2 * D + h * dk:2 * D + (h + 1) * dk]
                    for h in range(heads)], 0).astype(bf16)

    scores = jnp.einsum('hqd,hkd->hqk', qh, kh,
                        preferred_element_type=jnp.float32)                # (H, S, S)
    scores = scores + mask_bias                      # broadcast over heads
    # NOTE: fully-masked rows would give a uniform (not zero) distribution; the causal mask
    # used by this module always keeps the diagonal, so this cannot happen here.
    scores = scores - jnp.max(scores, axis=-1, keepdims=True)
    p = jnp.exp(scores)
    p = p * pl.reciprocal(jnp.sum(p, axis=-1, keepdims=True), approx=True)
    oh = jnp.einsum('hqk,hkd->hqd', p.astype(bf16), vh,
                    preferred_element_type=jnp.float32)                    # (H, S, dk)
    concat = jnp.concatenate([oh[h] for h in range(heads)], axis=-1)       # (S, D)
    attn = jnp.dot(concat.astype(bf16), wo_ref[...],
                   preferred_element_type=jnp.float32) + bo_ref[...]
    x = x + attn                                     # dropout == identity (eval)

    # ---- feed-forward sub-block (pre-norm, residual) ----
    x2 = _layernorm(x, n2a_ref[...], n2b_ref[...], in_kernel=True)
    h1 = jnp.dot(x2.astype(bf16), w1_ref[...],
                 preferred_element_type=jnp.float32) + b1_ref[...]
    h1 = jnp.maximum(h1, 0.0)
    ff = jnp.dot(h1.astype(bf16), w2_ref[...],
                 preferred_element_type=jnp.float32) + b2_ref[...]
    x = x + ff

    x_acc[...] = x

    # --- final norm + writeback only on the last layer (P3 accumulator finalize) ---
    @pl.when(layer == n_layers - 1)
    def _():
        o_ref[...] = _layernorm(x, nfa_ref[...], nfb_ref[...],
                                in_kernel=True).astype(o_ref.dtype)


# ---------------------------------------------------------------------------
# Wrapper
# ---------------------------------------------------------------------------
_PARAM_ORDER = ["n1_a", "n1_b", "wqkv", "bqkv", "wo", "bo",
                "n2_a", "n2_b", "w1", "b1", "w2", "b2"]


def _stack_layer_params(layers, weight_dtype=jnp.bfloat16):
    """Stack per-layer params into (N, ...) arrays; weight matrices stored in bf16.
    Q/K/V weights (and biases) are fused into a single (D, 3D) matrix per layer."""
    def mats(name):
        return jnp.stack([l[name] for l in layers]).astype(weight_dtype)   # (N, in, out)

    def rows(name):
        return jnp.stack([l[name] for l in layers])[:, None, :]            # (N, 1, d) f32

    wqkv = jnp.stack([jnp.concatenate([l["wq"], l["wk"], l["wv"]], axis=1)
                      for l in layers]).astype(weight_dtype)                # (N, D, 3D)
    bqkv = jnp.stack([jnp.concatenate([l["bq"], l["bk"], l["bv"]], axis=0)
                      for l in layers])[:, None, :]                         # (N, 1, 3D) f32

    return dict(
        n1_a=rows("n1_a"), n1_b=rows("n1_b"),
        wqkv=wqkv, bqkv=bqkv,
        wo=mats("wo"), bo=rows("bo"),
        n2_a=rows("n2_a"), n2_b=rows("n2_b"),
        w1=mats("w1"), b1=rows("b1"), w2=mats("w2"), b2=rows("b2"),
    )


def _layer_spec(arr):
    # (N, r, c) stacked per-layer array: block index follows the layer grid axis.
    return pl.BlockSpec((None,) + arr.shape[1:], lambda b, l: (l, 0, 0))


def decoder_forward(tu_xiang_liang, cao_zuo, trg_mask, params, N, heads):
    """Pallas implementation of Decoder.forward(图向量, 操作, trg_mask)."""
    del cao_zuo  # embed(操作) * 0 is exactly zero at eval — dead HBM gather removed (perf).
    B, S, D = tu_xiang_liang.shape
    x = (tu_xiang_liang + params["embedP"][:S][None]).astype(jnp.float32)

    # Additive mask bias computed once; exact `== 0` mirrors masked_fill(mask == 0, -1e9).
    mask_bias = jnp.where(trg_mask == 0, jnp.float32(-1e9), jnp.float32(0.0))

    stacked = _stack_layer_params(params["layers"])
    layer_args = [stacked[k] for k in _PARAM_ORDER]
    norm_a = params["norm_a"].reshape(1, D).astype(jnp.float32)
    norm_b = params["norm_b"].reshape(1, D).astype(jnp.float32)

    in_specs = (
        [pl.BlockSpec((None, S, D), lambda b, l: (b, 0, 0)),   # x: resident across layers
         pl.BlockSpec((None, S, S), lambda b, l: (b, 0, 0))]   # mask: resident across layers
        + [_layer_spec(a) for a in layer_args]                 # per-layer weights follow l
        + [pl.BlockSpec((1, D), lambda b, l: (0, 0)),          # final norm alpha
           pl.BlockSpec((1, D), lambda b, l: (0, 0))]          # final norm bias
    )

    return pl.pallas_call(
        partial(decoder_stack_kernel, heads=heads),
        out_shape=jax.ShapeDtypeStruct((B, S, D), tu_xiang_liang.dtype),
        grid=(B, N),
        in_specs=in_specs,
        out_specs=pl.BlockSpec((None, S, D), lambda b, l: (b, 0, 0)),
        scratch_shapes=[pltpu.VMEM((S, D), jnp.float32)],       # residual-stream accumulator
        compiler_params=pltpu.CompilerParams(
            dimension_semantics=("parallel", "arbitrary")),     # batch -> megacore, layer -> loop
    )(x, mask_bias, *layer_args, norm_a, norm_b)


# ---------------------------------------------------------------------------
# Pure-JAX reference (same math incl. bf16 matmul operands) for correctness checking
# ---------------------------------------------------------------------------
def reference_forward(tu_xiang_liang, cao_zuo, trg_mask, params, N, heads):
    del cao_zuo
    bf = lambda a: a.astype(jnp.bfloat16)
    f32dot = lambda a, b: jnp.dot(bf(a), bf(b), preferred_element_type=jnp.float32)
    B, S, D = tu_xiang_liang.shape
    dk = D // heads
    x = (tu_xiang_liang + params["embedP"][:S][None]).astype(jnp.float32)
    mask_bias = jnp.where(trg_mask == 0, jnp.float32(-1e9), jnp.float32(0.0))
    for i in range(N):
        p = params["layers"][i]
        x2 = _layernorm(x, p["n1_a"], p["n1_b"])
        q = f32dot(x2, p["wq"]) + p["bq"]
        k = f32dot(x2, p["wk"]) + p["bk"]
        v = f32dot(x2, p["wv"]) + p["bv"]
        q = q.reshape(B, S, heads, dk).transpose(0, 2, 1, 3)
        k = k.reshape(B, S, heads, dk).transpose(0, 2, 1, 3)
        v = v.reshape(B, S, heads, dk).transpose(0, 2, 1, 3)
        s = jnp.einsum("bhqd,bhkd->bhqk", bf(q), bf(k),
                       preferred_element_type=jnp.float32) / jnp.sqrt(jnp.float32(dk))
        s = s + mask_bias[:, None]
        a = jax.nn.softmax(s, axis=-1)
        o = jnp.einsum("bhqk,bhkd->bhqd", bf(a), bf(v),
                       preferred_element_type=jnp.float32)
        o = o.transpose(0, 2, 1, 3).reshape(B, S, D)
        x = x + (f32dot(o, p["wo"]) + p["bo"])
        x2 = _layernorm(x, p["n2_a"], p["n2_b"])
        h1 = jnp.maximum(f32dot(x2, p["w1"]) + p["b1"], 0.0)
        x = x + (f32dot(h1, p["w2"]) + p["b2"])
    return _layernorm(x, params["norm_a"], params["norm_b"])


# ---------------------------------------------------------------------------
# Deterministic parameter init (f32 master copies; wrapper casts weights to bf16)
# ---------------------------------------------------------------------------
def init_params(key, vocab_size, max_len, d_model, d_ff, N):
    kit = iter(jax.random.split(key, 6 + 12 * N))
    nrm = lambda shape, s=0.02: (s * jax.random.normal(next(kit), shape)).astype(jnp.float32)
    params = {
        "embed": nrm((vocab_size, d_model)),    # unused in forward: embed(操作)*0 == 0
        "embedP": nrm((max_len, d_model)),
        "norm_a": jnp.ones((d_model,), jnp.float32),
        "norm_b": jnp.zeros((d_model,), jnp.float32),
        "layers": [],
    }
    for _ in range(N):
        params["layers"].append({
            "n1_a": jnp.ones((d_model,), jnp.float32),
            "n1_b": jnp.zeros((d_model,), jnp.float32),
            "wq": nrm((d_model, d_model)), "bq": nrm((d_model,)),
            "wk": nrm((d_model, d_model)), "bk": nrm((d_model,)),
            "wv": nrm((d_model, d_model)), "bv": nrm((d_model,)),
            "wo": nrm((d_model, d_model)), "bo": nrm((d_model,)),
            "n2_a": jnp.ones((d_model,), jnp.float32),
            "n2_b": jnp.zeros((d_model,), jnp.float32),
            "w1": nrm((d_model, d_ff)), "b1": nrm((d_ff,)),
            "w2": nrm((d_ff, d_model)), "b2": nrm((d_model,)),
        })
    return params


if __name__ == "__main__":
    # Small shapes consistent with the module's forward.
    B, S, D, H, N = 2, 8, 32, 4, 2
    VOCAB, MAX_LEN, D_FF = 50, 1024, 128

    key = jax.random.PRNGKey(0)
    k_in, k_tok, k_par = jax.random.split(key, 3)

    tu_xiang_liang = jax.random.normal(k_in, (B, S, D), dtype=jnp.float32)      # 图向量
    cao_zuo = jax.random.randint(k_tok, (B, S), 0, VOCAB)                        # 操作
    trg_mask = jnp.tril(jnp.ones((S, S), jnp.float32))[None].repeat(B, axis=0)   # causal mask

    params = init_params(k_par, VOCAB, MAX_LEN, D, D_FF, N)

    fwd = jax.jit(decoder_forward, static_argnums=(4, 5))
    out = jax.block_until_ready(fwd(tu_xiang_liang, cao_zuo, trg_mask, params, N, H))

    ref = reference_forward(tu_xiang_liang, cao_zuo, trg_mask, params, N, H)
    assert out.shape == (B, S, D)
    # bf16 MXU operands + approx reciprocals -> compare with a matching-precision reference.
    assert jnp.max(jnp.abs(out - ref)) < 2e-2, "mismatch vs pure-JAX reference"

    print("KERNEL_OK")
</pallas_src>

<mosaic_0001>
module attributes {stable_mosaic.version = 11 : i64} {
  func.func @decoder_stack_kernel(%arg0: i32, %arg1: i32, %arg2: memref<1x8x32xf32, #tpu.memory_space<vmem>>, %arg3: memref<1x8x8xf32, #tpu.memory_space<vmem>>, %arg4: memref<1x1x32xf32, #tpu.memory_space<vmem>>, %arg5: memref<1x1x32xf32, #tpu.memory_space<vmem>>, %arg6: memref<1x32x96xbf16, #tpu.memory_space<vmem>>, %arg7: memref<1x1x96xf32, #tpu.memory_space<vmem>>, %arg8: memref<1x32x32xbf16, #tpu.memory_space<vmem>>, %arg9: memref<1x1x32xf32, #tpu.memory_space<vmem>>, %arg10: memref<1x1x32xf32, #tpu.memory_space<vmem>>, %arg11: memref<1x1x32xf32, #tpu.memory_space<vmem>>, %arg12: memref<1x32x128xbf16, #tpu.memory_space<vmem>>, %arg13: memref<1x1x128xf32, #tpu.memory_space<vmem>>, %arg14: memref<1x128x32xbf16, #tpu.memory_space<vmem>>, %arg15: memref<1x1x32xf32, #tpu.memory_space<vmem>>, %arg16: memref<1x32xf32, #tpu.memory_space<vmem>>, %arg17: memref<1x32xf32, #tpu.memory_space<vmem>>, %arg18: memref<1x8x32xf32, #tpu.memory_space<vmem>>, %arg19: memref<8x32xf32, #tpu.memory_space<vmem>>) attributes {dimension_semantics = [#tpu.dimension_semantics<parallel>, #tpu.dimension_semantics<arbitrary>], iteration_bounds = array<i64: 2, 2>, scalar_prefetch = 0 : i64, scratch_operands = 1 : i64, tpu.core_type = #tpu.core_type<tc>, window_params = [{transform_indices = @transform_0, window_bounds = array<i64: 1, 8, 32>}, {transform_indices = @transform_1, window_bounds = array<i64: 1, 8, 8>}, {transform_indices = @transform_2, window_bounds = array<i64: 1, 1, 32>}, {transform_indices = @transform_3, window_bounds = array<i64: 1, 1, 32>}, {transform_indices = @transform_4, window_bounds = array<i64: 1, 32, 96>}, {transform_indices = @transform_5, window_bounds = array<i64: 1, 1, 96>}, {transform_indices = @transform_6, window_bounds = array<i64: 1, 32, 32>}, {transform_indices = @transform_7, window_bounds = array<i64: 1, 1, 32>}, {transform_indices = @transform_8, window_bounds = array<i64: 1, 1, 32>}, {transform_indices = @transform_9, window_bounds = array<i64: 1, 1, 32>}, {transform_indices = @transform_10, window_bounds = array<i64: 1, 32, 128>}, {transform_indices = @transform_11, window_bounds = array<i64: 1, 1, 128>}, {transform_indices = @transform_12, window_bounds = array<i64: 1, 128, 32>}, {transform_indices = @transform_13, window_bounds = array<i64: 1, 1, 32>}, {pipeline_mode = #tpu.pipeline_mode<synchronous>, transform_indices = @transform_14, window_bounds = array<i64: 1, 32>}, {pipeline_mode = #tpu.pipeline_mode<synchronous>, transform_indices = @transform_15, window_bounds = array<i64: 1, 32>}, {transform_indices = @transform_16, window_bounds = array<i64: 1, 8, 32>}]} {
    %c0_i32 = arith.constant 0 : i32
    %0 = arith.cmpi eq, %arg1, %c0_i32 : i32
    %1 = arith.extui %0 : i1 to i32
    %c0_i32_0 = arith.constant 0 : i32
    %2 = arith.cmpi ne, %1, %c0_i32_0 : i32
    scf.if %2 {
      %c0_63 = arith.constant 0 : index
      %c0_64 = arith.constant 0 : index
      %c0_65 = arith.constant 0 : index
      %158 = vector.load %arg2[%c0_63, %c0_64, %c0_65] : memref<1x8x32xf32, #tpu.memory_space<vmem>>, vector<1x8x32xf32>
      %159 = vector.shape_cast %158 : vector<1x8x32xf32> to vector<8x32xf32>
      %c0_66 = arith.constant 0 : index
      %c0_67 = arith.constant 0 : index
      %160 = vector.load %arg19[%c0_66, %c0_67] : memref<8x32xf32, #tpu.memory_space<vmem>>, vector<8x32xf32>
      tpu.vector_store %arg19[%c0_66, %c0_67], %159 {strides = array<i32>} : memref<8x32xf32, #tpu.memory_space<vmem>>, vector<8x32xf32>,
    } else {
    }
    %c0 = arith.constant 0 : index
    %c0_1 = arith.constant 0 : index
    %3 = vector.load %arg19[%c0, %c0_1] : memref<8x32xf32, #tpu.memory_space<vmem>>, vector<8x32xf32>
    %c0_2 = arith.constant 0 : index
    %c0_3 = arith.constant 0 : index
    %c0_4 = arith.constant 0 : index
    %4 = vector.load %arg3[%c0_2, %c0_3, %c0_4] : memref<1x8x8xf32, #tpu.memory_space<vmem>>, vector<1x8x8xf32>
    %5 = vector.shape_cast %4 : vector<1x8x8xf32> to vector<8x8xf32>
    %c0_5 = arith.constant 0 : index
    %c0_6 = arith.constant 0 : index
    %c0_7 = arith.constant 0 : index
    %6 = vector.load %arg4[%c0_5, %c0_6, %c0_7] : memref<1x1x32xf32, #tpu.memory_space<vmem>>, vector<1x1x32xf32>
    %7 = vector.shape_cast %6 : vector<1x1x32xf32> to vector<1x32xf32>
    %c0_8 = arith.constant 0 : index
    %c0_9 = arith.constant 0 : index
    %c0_10 = arith.constant 0 : index
    %8 = vector.load %arg5[%c0_8, %c0_9, %c0_10] : memref<1x1x32xf32, #tpu.memory_space<vmem>>, vector<1x1x32xf32>
    %9 = vector.shape_cast %8 : vector<1x1x32xf32> to vector<1x32xf32>
    %cst = arith.constant dense<0.000000e+00> : vector<8xf32>
    %10 = vector.multi_reduction <add>, %3, %cst [1] : vector<8x32xf32> to vector<8xf32>
    %11 = vector.shape_cast %10 : vector<8xf32> to vector<8x1xf32>
    %cst_11 = arith.constant 3.200000e+01 : f32
    %12 = vector.broadcast %cst_11 : f32 to vector<8x1xf32>
    %13 = arith.divf %11, %12 : vector<8x1xf32>
    %14 = vector.broadcast %13 : vector<8x1xf32> to vector<8x32xf32>
    %15 = arith.subf %3, %14 : vector<8x32xf32>
    %16 = arith.mulf %15, %15 : vector<8x32xf32>
    %cst_12 = arith.constant dense<0.000000e+00> : vector<8xf32>
    %17 = vector.multi_reduction <add>, %16, %cst_12 [1] : vector<8x32xf32> to vector<8xf32>
    %18 = vector.shape_cast %17 : vector<8xf32> to vector<8x1xf32>
    %cst_13 = arith.constant 3.100000e+01 : f32
    %19 = vector.broadcast %cst_13 : f32 to vector<8x1xf32>
    %20 = arith.divf %18, %19 : vector<8x1xf32>
    %21 = math.sqrt %20 : vector<8x1xf32>
    %cst_14 = arith.constant 9.99999997E-7 : f32
    %22 = vector.broadcast %cst_14 : f32 to vector<8x1xf32>
    %23 = arith.addf %21, %22 : vector<8x1xf32>
    %24 = tpu.reciprocal %23 {approx = true} : vector<8x1xf32> -> vector<8x1xf32>
    %25 = vector.broadcast %13 : vector<8x1xf32> to vector<8x32xf32>
    %26 = arith.subf %3, %25 : vector<8x32xf32>
    %27 = vector.broadcast %7 : vector<1x32xf32> to vector<8x32xf32>
    %28 = arith.mulf %27, %26 : vector<8x32xf32>
    %29 = vector.broadcast %24 : vector<8x1xf32> to vector<8x32xf32>
    %30 = arith.mulf %28, %29 : vector<8x32xf32>
    %31 = vector.broadcast %9 : vector<1x32xf32> to vector<8x32xf32>
    %32 = arith.addf %30, %31 : vector<8x32xf32>
    %33 = arith.truncf %32 : vector<8x32xf32> to vector<8x32xbf16>
    %c0_15 = arith.constant 0 : index
    %c0_16 = arith.constant 0 : index
    %c0_17 = arith.constant 0 : index
    %34 = vector.load %arg6[%c0_15, %c0_16, %c0_17] : memref<1x32x96xbf16, #tpu.memory_space<vmem>>, vector<1x32x96xbf16>
    %35 = vector.shape_cast %34 : vector<1x32x96xbf16> to vector<32x96xbf16>
    %cst_18 = arith.constant dense<0.000000e+00> : vector<8x96xf32>
    %36 = tpu.matmul %33, %35, %cst_18 {dimension_numbers = #tpu.dot_dimension_numbers<[1], [0], [0], [1], [0, 0, 1, 1], [], []>} : vector<8x32xbf16>, vector<32x96xbf16>, vector<8x96xf32> -> vector<8x96xf32>
    %c0_19 = arith.constant 0 : index
    %c0_20 = arith.constant 0 : index
    %c0_21 = arith.constant 0 : index
    %37 = vector.load %arg7[%c0_19, %c0_20, %c0_21] : memref<1x1x96xf32, #tpu.memory_space<vmem>>, vector<1x1x96xf32>
    %38 = vector.shape_cast %37 : vector<1x1x96xf32> to vector<1x96xf32>
    %39 = vector.broadcast %38 : vector<1x96xf32> to vector<8x96xf32>
    %40 = arith.addf %36, %39 : vector<8x96xf32>
    %41 = vector.extract_strided_slice %40 {offsets = [0, 0], sizes = [8, 32], strides = [1, 1]} : vector<8x96xf32> to vector<8x32xf32>
    %cst_22 = arith.constant 0.353553385 : f32
    %42 = vector.broadcast %cst_22 : f32 to vector<8x32xf32>
    %43 = arith.mulf %41, %42 : vector<8x32xf32>
    %44 = vector.extract_strided_slice %43 {offsets = [0, 0], sizes = [8, 8], strides = [1, 1]} : vector<8x32xf32> to vector<8x8xf32>
    %45 = vector.extract_strided_slice %43 {offsets = [0, 8], sizes = [8, 8], strides = [1, 1]} : vector<8x32xf32> to vector<8x8xf32>
    %46 = vector.extract_strided_slice %43 {offsets = [0, 16], sizes = [8, 8], strides = [1, 1]} : vector<8x32xf32> to vector<8x8xf32>
    %47 = vector.extract_strided_slice %43 {offsets = [0, 24], sizes = [8, 8], strides = [1, 1]} : vector<8x32xf32> to vector<8x8xf32>
    %48 = vector.shape_cast %44 : vector<8x8xf32> to vector<1x8x8xf32>
    %49 = vector.shape_cast %45 : vector<8x8xf32> to vector<1x8x8xf32>
    %50 = vector.shape_cast %46 : vector<8x8xf32> to vector<1x8x8xf32>
    %51 = vector.shape_cast %47 : vector<8x8xf32> to vector<1x8x8xf32>
    %52 = tpu.concatenate %48, %49, %50, %51 in 0 : vector<1x8x8xf32>, vector<1x8x8xf32>, vector<1x8x8xf32>, vector<1x8x8xf32> -> vector<4x8x8xf32>
    %53 = arith.truncf %52 : vector<4x8x8xf32> to vector<4x8x8xbf16>
    %54 = vector.extract_strided_slice %40 {offsets = [0, 32], sizes = [8, 8], strides = [1, 1]} : vector<8x96xf32> to vector<8x8xf32>
    %55 = vector.extract_strided_slice %40 {offsets = [0, 40], sizes = [8, 8], strides = [1, 1]} : vector<8x96xf32> to vector<8x8xf32>
    %56 = vector.extract_strided_slice %40 {offsets = [0, 48], sizes = [8, 8], strides = [1, 1]} : vector<8x96xf32> to vector<8x8xf32>
    %57 = vector.extract_strided_slice %40 {offsets = [0, 56], sizes = [8, 8], strides = [1, 1]} : vector<8x96xf32> to vector<8x8xf32>
    %58 = vector.shape_cast %54 : vector<8x8xf32> to vector<1x8x8xf32>
    %59 = vector.shape_cast %55 : vector<8x8xf32> to vector<1x8x8xf32>
    %60 = vector.shape_cast %56 : vector<8x8xf32> to vector<1x8x8xf32>
    %61 = vector.shape_cast %57 : vector<8x8xf32> to vector<1x8x8xf32>
    %62 = tpu.concatenate %58, %59, %60, %61 in 0 : vector<1x8x8xf32>, vector<1x8x8xf32>, vector<1x8x8xf32>, vector<1x8x8xf32> -> vector<4x8x8xf32>
    %63 = arith.truncf %62 : vector<4x8x8xf32> to vector<4x8x8xbf16>
    %64 = vector.extract_strided_slice %40 {offsets = [0, 64], sizes = [8, 8], strides = [1, 1]} : vector<8x96xf32> to vector<8x8xf32>
    %65 = vector.extract_strided_slice %40 {offsets = [0, 72], sizes = [8, 8], strides = [1, 1]} : vector<8x96xf32> to vector<8x8xf32>
    %66 = vector.extract_strided_slice %40 {offsets = [0, 80], sizes = [8, 8], strides = [1, 1]} : vector<8x96xf32> to vector<8x8xf32>
    %67 = vector.extract_strided_slice %40 {offsets = [0, 88], sizes = [8, 8], strides = [1, 1]} : vector<8x96xf32> to vector<8x8xf32>
    %68 = vector.shape_cast %64 : vector<8x8xf32> to vector<1x8x8xf32>
    %69 = vector.shape_cast %65 : vector<8x8xf32> to vector<1x8x8xf32>
    %70 = vector.shape_cast %66 : vector<8x8xf32> to vector<1x8x8xf32>
    %71 = vector.shape_cast %67 : vector<8x8xf32> to vector<1x8x8xf32>
    %72 = tpu.concatenate %68, %69, %70, %71 in 0 : vector<1x8x8xf32>, vector<1x8x8xf32>, vector<1x8x8xf32>, vector<1x8x8xf32> -> vector<4x8x8xf32>
    %73 = arith.truncf %72 : vector<4x8x8xf32> to vector<4x8x8xbf16>
    "tpu.trace_start"() <{level = 10 : i32, message = "hqd,hkd->hqk"}> : () -> ()
    %cst_23 = arith.constant dense<0.000000e+00> : vector<4x8x8xf32>
    %74 = tpu.matmul %53, %63, %cst_23 {dimension_numbers = #tpu.dot_dimension_numbers<[2], [2], [1], [1], [0, 0, 0, 1, 1, 1], [0], [0]>} : vector<4x8x8xbf16>, vector<4x8x8xbf16>, vector<4x8x8xf32> -> vector<4x8x8xf32>
    "tpu.trace_stop"() : () -> ()
    %75 = vector.shape_cast %5 : vector<8x8xf32> to vector<1x8x8xf32>
    %76 = vector.broadcast %75 : vector<1x8x8xf32> to vector<4x8x8xf32>
    %77 = arith.addf %74, %76 : vector<4x8x8xf32>
    %cst_24 = arith.constant dense<0xFF800000> : vector<4x8xf32>
    %78 = vector.multi_reduction <maximumf>, %77, %cst_24 [2] : vector<4x8x8xf32> to vector<4x8xf32>
    %79 = vector.shape_cast %78 : vector<4x8xf32> to vector<4x8x1xf32>
    %80 = vector.broadcast %79 : vector<4x8x1xf32> to vector<4x8x8xf32>
    %81 = arith.subf %77, %80 : vector<4x8x8xf32>
    %82 = math.exp %81 : vector<4x8x8xf32>
    %cst_25 = arith.constant dense<0.000000e+00> : vector<4x8xf32>
    %83 = vector.multi_reduction <add>, %82, %cst_25 [2] : vector<4x8x8xf32> to vector<4x8xf32>
    %84 = vector.shape_cast %83 : vector<4x8xf32> to vector<4x8x1xf32>
    %85 = tpu.reciprocal %84 {approx = true} : vector<4x8x1xf32> -> vector<4x8x1xf32>
    %86 = vector.broadcast %85 : vector<4x8x1xf32> to vector<4x8x8xf32>
    %87 = arith.mulf %82, %86 : vector<4x8x8xf32>
    %88 = arith.truncf %87 : vector<4x8x8xf32> to vector<4x8x8xbf16>
    "tpu.trace_start"() <{level = 10 : i32, message = "hqk,hkd->hqd"}> : () -> ()
    %cst_26 = arith.constant dense<0.000000e+00> : vector<4x8x8xf32>
    %89 = tpu.matmul %88, %73, %cst_26 {dimension_numbers = #tpu.dot_dimension_numbers<[2], [1], [1], [2], [0, 0, 0, 1, 1, 2], [0], [0]>} : vector<4x8x8xbf16>, vector<4x8x8xbf16>, vector<4x8x8xf32> -> vector<4x8x8xf32>
    "tpu.trace_stop"() : () -> ()
    %90 = vector.extract_strided_slice %89 {offsets = [0, 0, 0], sizes = [1, 8, 8], strides = [1, 1, 1]} : vector<4x8x8xf32> to vector<1x8x8xf32>
    %91 = vector.shape_cast %90 : vector<1x8x8xf32> to vector<8x8xf32>
    %92 = vector.extract_strided_slice %89 {offsets = [1, 0, 0], sizes = [1, 8, 8], strides = [1, 1, 1]} : vector<4x8x8xf32> to vector<1x8x8xf32>
    %93 = vector.shape_cast %92 : vector<1x8x8xf32> to vector<8x8xf32>
    %94 = vector.extract_strided_slice %89 {offsets = [2, 0, 0], sizes = [1, 8, 8], strides = [1, 1, 1]} : vector<4x8x8xf32> to vector<1x8x8xf32>
    %95 = vector.shape_cast %94 : vector<1x8x8xf32> to vector<8x8xf32>
    %96 = vector.extract_strided_slice %89 {offsets = [3, 0, 0], sizes = [1, 8, 8], strides = [1, 1, 1]} : vector<4x8x8xf32> to vector<1x8x8xf32>
    %97 = vector.shape_cast %96 : vector<1x8x8xf32> to vector<8x8xf32>
    %98 = tpu.concatenate %91, %93, %95, %97 in 1 : vector<8x8xf32>, vector<8x8xf32>, vector<8x8xf32>, vector<8x8xf32> -> vector<8x32xf32>
    %99 = arith.truncf %98 : vector<8x32xf32> to vector<8x32xbf16>
    %c0_27 = arith.constant 0 : index
    %c0_28 = arith.constant 0 : index
    %c0_29 = arith.constant 0 : index
    %100 = vector.load %arg8[%c0_27, %c0_28, %c0_29] : memref<1x32x32xbf16, #tpu.memory_space<vmem>>, vector<1x32x32xbf16>
    %101 = vector.shape_cast %100 : vector<1x32x32xbf16> to vector<32x32xbf16>
    %cst_30 = arith.constant dense<0.000000e+00> : vector<8x32xf32>
    %102 = tpu.matmul %99, %101, %cst_30 {dimension_numbers = #tpu.dot_dimension_numbers<[1], [0], [0], [1], [0, 0, 1, 1], [], []>} : vector<8x32xbf16>, vector<32x32xbf16>, vector<8x32xf32> -> vector<8x32xf32>
    %c0_31 = arith.constant 0 : index
    %c0_32 = arith.constant 0 : index
    %c0_33 = arith.constant 0 : index
    %103 = vector.load %arg9[%c0_31, %c0_32, %c0_33] : memref<1x1x32xf32, #tpu.memory_space<vmem>>, vector<1x1x32xf32>
    %104 = vector.shape_cast %103 : vector<1x1x32xf32> to vector<1x32xf32>
    %105 = vector.broadcast %104 : vector<1x32xf32> to vector<8x32xf32>
    %106 = arith.addf %102, %105 : vector<8x32xf32>
    %107 = arith.addf %3, %106 : vector<8x32xf32>
    %c0_34 = arith.constant 0 : index
    %c0_35 = arith.constant 0 : index
    %c0_36 = arith.constant 0 : index
    %108 = vector.load %arg10[%c0_34, %c0_35, %c0_36] : memref<1x1x32xf32, #tpu.memory_space<vmem>>, vector<1x1x32xf32>
    %109 = vector.shape_cast %108 : vector<1x1x32xf32> to vector<1x32xf32>
    %c0_37 = arith.constant 0 : index
    %c0_38 = arith.constant 0 : index
    %c0_39 = arith.constant 0 : index
    %110 = vector.load %arg11[%c0_37, %c0_38, %c0_39] : memref<1x1x32xf32, #tpu.memory_space<vmem>>, vector<1x1x32xf32>
    %111 = vector.shape_cast %110 : vector<1x1x32xf32> to vector<1x32xf32>
    %cst_40 = arith.constant dense<0.000000e+00> : vector<8xf32>
    %112 = vector.multi_reduction <add>, %107, %cst_40 [1] : vector<8x32xf32> to vector<8xf32>
    %113 = vector.shape_cast %112 : vector<8xf32> to vector<8x1xf32>
    %cst_41 = arith.constant 3.200000e+01 : f32
    %114 = vector.broadcast %cst_41 : f32 to vector<8x1xf32>
    %115 = arith.divf %113, %114 : vector<8x1xf32>
    %116 = vector.broadcast %115 : vector<8x1xf32> to vector<8x32xf32>
    %117 = arith.subf %107, %116 : vector<8x32xf32>
    %118 = arith.mulf %117, %117 : vector<8x32xf32>
    %cst_42 = arith.constant dense<0.000000e+00> : vector<8xf32>
    %119 = vector.multi_reduction <add>, %118, %cst_42 [1] : vector<8x32xf32> to vector<8xf32>
    %120 = vector.shape_cast %119 : vector<8xf32> to vector<8x1xf32>
    %cst_43 = arith.constant 3.100000e+01 : f32
    %121 = vector.broadcast %cst_43 : f32 to vector<8x1xf32>
    %122 = arith.divf %120, %121 : vector<8x1xf32>
    %123 = math.sqrt %122 : vector<8x1xf32>
    %cst_44 = arith.constant 9.99999997E-7 : f32
    %124 = vector.broadcast %cst_44 : f32 to vector<8x1xf32>
    %125 = arith.addf %123, %124 : vector<8x1xf32>
    %126 = tpu.reciprocal %125 {approx = true} : vector<8x1xf32> -> vector<8x1xf32>
    %127 = vector.broadcast %115 : vector<8x1xf32> to vector<8x32xf32>
    %128 = arith.subf %107, %127 : vector<8x32xf32>
    %129 = vector.broadcast %109 : vector<1x32xf32> to vector<8x32xf32>
    %130 = arith.mulf %129, %128 : vector<8x32xf32>
    %131 = vector.broadcast %126 : vector<8x1xf32> to vector<8x32xf32>
    %132 = arith.mulf %130, %131 : vector<8x32xf32>
    %133 = vector.broadcast %111 : vector<1x32xf32> to vector<8x32xf32>
    %134 = arith.addf %132, %133 : vector<8x32xf32>
    %135 = arith.truncf %134 : vector<8x32xf32> to vector<8x32xbf16>
    %c0_45 = arith.constant 0 : index
    %c0_46 = arith.constant 0 : index
    %c0_47 = arith.constant 0 : index
    %136 = vector.load %arg12[%c0_45, %c0_46, %c0_47] : memref<1x32x128xbf16, #tpu.memory_space<vmem>>, vector<1x32x128xbf16>
    %137 = vector.shape_cast %136 : vector<1x32x128xbf16> to vector<32x128xbf16>
    %cst_48 = arith.constant dense<0.000000e+00> : vector<8x128xf32>
    %138 = tpu.matmul %135, %137, %cst_48 {dimension_numbers = #tpu.dot_dimension_numbers<[1], [0], [0], [1], [0, 0, 1, 1], [], []>} : vector<8x32xbf16>, vector<32x128xbf16>, vector<8x128xf32> -> vector<8x128xf32>
    %c0_49 = arith.constant 0 : index
    %c0_50 = arith.constant 0 : index
    %c0_51 = arith.constant 0 : index
    %139 = vector.load %arg13[%c0_49, %c0_50, %c0_51] : memref<1x1x128xf32, #tpu.memory_space<vmem>>, vector<1x1x128xf32>
    %140 = vector.shape_cast %139 : vector<1x1x128xf32> to vector<1x128xf32>
    %141 = vector.broadcast %140 : vector<1x128xf32> to vector<8x128xf32>
    %142 = arith.addf %138, %141 : vector<8x128xf32>
    %cst_52 = arith.constant 0.000000e+00 : f32
    %143 = vector.broadcast %cst_52 : f32 to vector<8x128xf32>
    %144 = arith.maximumf %142, %143 : vector<8x128xf32>
    %145 = arith.truncf %144 : vector<8x128xf32> to vector<8x128xbf16>
    %c0_53 = arith.constant 0 : index
    %c0_54 = arith.constant 0 : index
    %c0_55 = arith.constant 0 : index
    %146 = vector.load %arg14[%c0_53, %c0_54, %c0_55] : memref<1x128x32xbf16, #tpu.memory_space<vmem>>, vector<1x128x32xbf16>
    %147 = vector.shape_cast %146 : vector<1x128x32xbf16> to vector<128x32xbf16>
    %cst_56 = arith.constant dense<0.000000e+00> : vector<8x32xf32>
    %148 = tpu.matmul %145, %147, %cst_56 {dimension_numbers = #tpu.dot_dimension_numbers<[1], [0], [0], [1], [0, 0, 1, 1], [], []>} : vector<8x128xbf16>, vector<128x32xbf16>, vector<8x32xf32> -> vector<8x32xf32>
    %c0_57 = arith.constant 0 : index
    %c0_58 = arith.constant 0 : index
    %c0_59 = arith.constant 0 : index
    %149 = vector.load %arg15[%c0_57, %c0_58, %c0_59] : memref<1x1x32xf32, #tpu.memory_space<vmem>>, vector<1x1x32xf32>
    %150 = vector.shape_cast %149 : vector<1x1x32xf32> to vector<1x32xf32>
    %151 = vector.broadcast %150 : vector<1x32xf32> to vector<8x32xf32>
    %152 = arith.addf %148, %151 : vector<8x32xf32>
    %153 = arith.addf %107, %152 : vector<8x32xf32>
    %c0_60 = arith.constant 0 : index
    %c0_61 = arith.constant 0 : index
    %154 = vector.load %arg19[%c0_60, %c0_61] : memref<8x32xf32, #tpu.memory_space<vmem>>, vector<8x32xf32>
    tpu.vector_store %arg19[%c0_60, %c0_61], %153 {strides = array<i32>} : memref<8x32xf32, #tpu.memory_space<vmem>>, vector<8x32xf32>,
    %c1_i32 = arith.constant 1 : i32
    %155 = arith.cmpi eq, %arg1, %c1_i32 : i32
    %156 = arith.extui %155 : i1 to i32
    %c0_i32_62 = arith.constant 0 : i32
    %157 = arith.cmpi ne, %156, %c0_i32_62 : i32
    scf.if %157 {
      %c0_63 = arith.constant 0 : index
      %c0_64 = arith.constant 0 : index
      %158 = vector.load %arg16[%c0_63, %c0_64] : memref<1x32xf32, #tpu.memory_space<vmem>>, vector<1x32xf32>
      %c0_65 = arith.constant 0 : index
      %c0_66 = arith.constant 0 : index
      %159 = vector.load %arg17[%c0_65, %c0_66] : memref<1x32xf32, #tpu.memory_space<vmem>>, vector<1x32xf32>
      %cst_67 = arith.constant dense<0.000000e+00> : vector<8xf32>
      %160 = vector.multi_reduction <add>, %153, %cst_67 [1] : vector<8x32xf32> to vector<8xf32>
      %161 = vector.shape_cast %160 : vector<8xf32> to vector<8x1xf32>
      %cst_68 = arith.constant 3.200000e+01 : f32
      %162 = vector.broadcast %cst_68 : f32 to vector<8x1xf32>
      %163 = arith.divf %161, %162 : vector<8x1xf32>
      %164 = vector.broadcast %163 : vector<8x1xf32> to vector<8x32xf32>
      %165 = arith.subf %153, %164 : vector<8x32xf32>
      %166 = arith.mulf %165, %165 : vector<8x32xf32>
      %cst_69 = arith.constant dense<0.000000e+00> : vector<8xf32>
      %167 = vector.multi_reduction <add>, %166, %cst_69 [1] : vector<8x32xf32> to vector<8xf32>
      %168 = vector.shape_cast %167 : vector<8xf32> to vector<8x1xf32>
      %cst_70 = arith.constant 3.100000e+01 : f32
      %169 = vector.broadcast %cst_70 : f32 to vector<8x1xf32>
      %170 = arith.divf %168, %169 : vector<8x1xf32>
      %171 = math.sqrt %170 : vector<8x1xf32>
      %cst_71 = arith.constant 9.99999997E-7 : f32
      %172 = vector.broadcast %cst_71 : f32 to vector<8x1xf32>
      %173 = arith.addf %171, %172 : vector<8x1xf32>
      %174 = tpu.reciprocal %173 {approx = true} : vector<8x1xf32> -> vector<8x1xf32>
      %175 = vector.broadcast %163 : vector<8x1xf32> to vector<8x32xf32>
      %176 = arith.subf %153, %175 : vector<8x32xf32>
      %177 = vector.broadcast %158 : vector<1x32xf32> to vector<8x32xf32>
      %178 = arith.mulf %177, %176 : vector<8x32xf32>
      %179 = vector.broadcast %174 : vector<8x1xf32> to vector<8x32xf32>
      %180 = arith.mulf %178, %179 : vector<8x32xf32>
      %181 = vector.broadcast %159 : vector<1x32xf32> to vector<8x32xf32>
      %182 = arith.addf %180, %181 : vector<8x32xf32>
      %c0_72 = arith.constant 0 : index
      %c0_73 = arith.constant 0 : index
      %c0_74 = arith.constant 0 : index
      %183 = vector.load %arg18[%c0_72, %c0_73, %c0_74] : memref<1x8x32xf32, #tpu.memory_space<vmem>>, vector<1x8x32xf32>
      %184 = vector.shape_cast %183 : vector<1x8x32xf32> to vector<8x32xf32>
      %185 = vector.shape_cast %182 : vector<8x32xf32> to vector<1x8x32xf32>
      tpu.vector_store %arg18[%c0_72, %c0_73, %c0_74], %185 {strides = array<i32>} : memref<1x8x32xf32, #tpu.memory_space<vmem>>, vector<1x8x32xf32>,
    } else {
    }
    return
  }
  func.func @transform_0(%arg0: i32, %arg1: i32) -> (i32, i32, i32) {
    %c0_i32 = arith.constant 0 : i32
    %c0_i32_0 = arith.constant 0 : i32
    %c0_i32_1 = arith.constant 0 : i32
    return %arg0, %c0_i32, %c0_i32_0 : i32, i32, i32
  }
  func.func @transform_1(%arg0: i32, %arg1: i32) -> (i32, i32, i32) {
    %c0_i32 = arith.constant 0 : i32
    %c0_i32_0 = arith.constant 0 : i32
    %c0_i32_1 = arith.constant 0 : i32
    return %arg0, %c0_i32, %c0_i32_0 : i32, i32, i32
  }
  func.func @transform_2(%arg0: i32, %arg1: i32) -> (i32, i32, i32) {
    %c0_i32 = arith.constant 0 : i32
    %c0_i32_0 = arith.constant 0 : i32
    %c0_i32_1 = arith.constant 0 : i32
    return %arg1, %c0_i32, %c0_i32_0 : i32, i32, i32
  }
  func.func @transform_3(%arg0: i32, %arg1: i32) -> (i32, i32, i32) {
    %c0_i32 = arith.constant 0 : i32
    %c0_i32_0 = arith.constant 0 : i32
    %c0_i32_1 = arith.constant 0 : i32
    return %arg1, %c0_i32, %c0_i32_0 : i32, i32, i32
  }
  func.func @transform_4(%arg0: i32, %arg1: i32) -> (i32, i32, i32) {
    %c0_i32 = arith.constant 0 : i32
    %c0_i32_0 = arith.constant 0 : i32
    %c0_i32_1 = arith.constant 0 : i32
    return %arg1, %c0_i32, %c0_i32_0 : i32, i32, i32
  }
  func.func @transform_5(%arg0: i32, %arg1: i32) -> (i32, i32, i32) {
    %c0_i32 = arith.constant 0 : i32
    %c0_i32_0 = arith.constant 0 : i32
    %c0_i32_1 = arith.constant 0 : i32
    return %arg1, %c0_i32, %c0_i32_0 : i32, i32, i32
  }
  func.func @transform_6(%arg0: i32, %arg1: i32) -> (i32, i32, i32) {
    %c0_i32 = arith.constant 0 : i32
    %c0_i32_0 = arith.constant 0 : i32
    %c0_i32_1 = arith.constant 0 : i32
    return %arg1, %c0_i32, %c0_i32_0 : i32, i32, i32
  }
  func.func @transform_7(%arg0: i32, %arg1: i32) -> (i32, i32, i32) {
    %c0_i32 = arith.constant 0 : i32
    %c0_i32_0 = arith.constant 0 : i32
    %c0_i32_1 = arith.constant 0 : i32
    return %arg1, %c0_i32, %c0_i32_0 : i32, i32, i32
  }
  func.func @transform_8(%arg0: i32, %arg1: i32) -> (i32, i32, i32) {
    %c0_i32 = arith.constant 0 : i32
    %c0_i32_0 = arith.constant 0 : i32
    %c0_i32_1 = arith.constant 0 : i32
    return %arg1, %c0_i32, %c0_i32_0 : i32, i32, i32
  }
  func.func @transform_9(%arg0: i32, %arg1: i32) -> (i32, i32, i32) {
    %c0_i32 = arith.constant 0 : i32
    %c0_i32_0 = arith.constant 0 : i32
    %c0_i32_1 = arith.constant 0 : i32
    return %arg1, %c0_i32, %c0_i32_0 : i32, i32, i32
  }
  func.func @transform_10(%arg0: i32, %arg1: i32) -> (i32, i32, i32) {
    %c0_i32 = arith.constant 0 : i32
    %c0_i32_0 = arith.constant 0 : i32
    %c0_i32_1 = arith.constant 0 : i32
    return %arg1, %c0_i32, %c0_i32_0 : i32, i32, i32
  }
  func.func @transform_11(%arg0: i32, %arg1: i32) -> (i32, i32, i32) {
    %c0_i32 = arith.constant 0 : i32
    %c0_i32_0 = arith.constant 0 : i32
    %c0_i32_1 = arith.constant 0 : i32
    return %arg1, %c0_i32, %c0_i32_0 : i32, i32, i32
  }
  func.func @transform_12(%arg0: i32, %arg1: i32) -> (i32, i32, i32) {
    %c0_i32 = arith.constant 0 : i32
    %c0_i32_0 = arith.constant 0 : i32
    %c0_i32_1 = arith.constant 0 : i32
    return %arg1, %c0_i32, %c0_i32_0 : i32, i32, i32
  }
  func.func @transform_13(%arg0: i32, %arg1: i32) -> (i32, i32, i32) {
    %c0_i32 = arith.constant 0 : i32
    %c0_i32_0 = arith.constant 0 : i32
    %c0_i32_1 = arith.constant 0 : i32
    return %arg1, %c0_i32, %c0_i32_0 : i32, i32, i32
  }
  func.func @transform_14(%arg0: i32, %arg1: i32) -> (i32, i32) {
    %c0_i32 = arith.constant 0 : i32
    %c0_i32_0 = arith.constant 0 : i32
    %c0_i32_1 = arith.constant 0 : i32
    return %c0_i32, %c0_i32_0 : i32, i32
  }
  func.func @transform_15(%arg0: i32, %arg1: i32) -> (i32, i32) {
    %c0_i32 = arith.constant 0 : i32
    %c0_i32_0 = arith.constant 0 : i32
    %c0_i32_1 = arith.constant 0 : i32
    return %c0_i32, %c0_i32_0 : i32, i32
  }
  func.func @transform_16(%arg0: i32, %arg1: i32) -> (i32, i32, i32) {
    %c0_i32 = arith.constant 0 : i32
    %c0_i32_0 = arith.constant 0 : i32
    %c0_i32_1 = arith.constant 0 : i32
    return %arg0, %c0_i32, %c0_i32_0 : i32, i32, i32
  }
}

</mosaic_0001>

<bundles_post_ra>
// kernel: decoder_forward.1
= control target key start
LH: loop header
LB: loop body
LE: loop exit
PB: predicated region body
PF: predicated region fallthrough
CT: control target
= control target key end

     0   :  { %s2758_s0 = inlined_call_operand.vmem [shape: f32[2,8,32], index: 0, kind: input, shape index: {}]   ;;  %s2759_s1 = inlined_call_operand.vmem [shape: f32[2,8,8], index: 1, kind: input, shape index: {}]   ;;  %s2760_s2 = inlined_call_operand.vmem [shape: f32[2,1,32], index: 2, kind: input, shape index: {}]   ;;  %s2761_s3 = inlined_call_operand.vmem [shape: f32[2,1,32], index: 3, kind: input, shape index: {}]   ;;  %s2762_s4 = inlined_call_operand.vmem [shape: bf16[2,32,96], index: 4, kind: input, shape index: {}]   ;;  %s2763_s5 = inlined_call_operand.vmem [shape: f32[2,1,96], index: 5, kind: input, shape index: {}]   ;;  %s2764_s6 = inlined_call_operand.vmem [shape: bf16[2,32,32], index: 6, kind: input, shape index: {}]   ;;  %s2765_s7 = inlined_call_operand.vmem [shape: f32[2,1,32], index: 7, kind: input, shape index: {}]   ;;  %s2766_s8 = inlined_call_operand.vmem [shape: f32[2,1,32], index: 8, kind: input, shape index: {}]   ;;  %s2767_s9 = inlined_call_operand.vmem [shape: f32[2,1,32], index: 9, kind: input, shape index: {}]   ;;  %s2768_s10 = inlined_call_operand.vmem [shape: bf16[2,32,128], index: 10, kind: input, shape index: {}]   ;;  %s2769_s11 = inlined_call_operand.vmem [shape: f32[2,1,128], index: 11, kind: input, shape index: {}]   ;;  %s2770_s12 = inlined_call_operand.vmem [shape: bf16[2,128,32], index: 12, kind: input, shape index: {}]   ;;  %s2771_s13 = inlined_call_operand.vmem [shape: f32[2,1,32], index: 13, kind: input, shape index: {}]   ;;  %s2772_s14 = inlined_call_operand.vmem [shape: f32[1,32], index: 14, kind: input, shape index: {}]   ;;  %s2773_s15 = inlined_call_operand.vmem [shape: f32[1,32], index: 15, kind: input, shape index: {}]   ;;  %s2774_s16 = inlined_call_operand.hbm [shape: f32[2,8,32], index: 16, kind: output, shape index: {}]  }
   0x1   :  { %2791 = sst [smem:[#allocation20_spill]] %s2758_s0 }
   0x2   :  { %2792 = sst [smem:[#allocation21_spill]] %s2759_s1 }
   0x3   :  { %2793 = sst [smem:[#allocation22_spill]] %s2762_s4 }
   0x4   :  { %2794 = sst [smem:[#allocation23_spill]] %s2764_s6 }
   0x5   :  { %2795 = sst [smem:[#allocation24_spill]] %s2771_s13 }
   0x6   :  { %2796 = sst [smem:[#allocation25_spill]] %s2772_s14 }
   0x7   :  { %2797 = sst [smem:[#allocation26_spill]] %s2773_s15 }
   0x8   :  { %2798 = sst [smem:[#allocation27_spill]] %s2774_s16 }
   0x9   :  { %21 = vsyncpa [#allocation4], 0 }
   0xa   :  { %23 = vsyncpa [#allocation4 + $0x1], 0  ;;  %s2383_s21 = smov 0   ;;  %s2385_s22 = smov 0  }
   0xb   :  { %s2387_s23 = smov 0   ;;  %s2389_s24 = smov 0  }
   0xc   :  { %s2391_s25 = smov 0   ;;  %s2393_s26 = smov 0  }
   0xd   :  { %s2395_s27 = smov 0   ;;  %s2397_s28 = smov 0  }
   0xe LB: > { %2799 = sst [smem:[#allocation6_spill]] %s2257_s21  ;;  %s1881_s29 = sadd.s32 4294967295, %s2285_s28   ;;  %s2285_s28 = sphi %s2397_s28, %s29_s28   ;;  %s2281_s27 = sphi %s2395_s27, %s2846_s27   ;;  %s2277_s26 = sphi %s2393_s26, %s2845_s26   ;;  %s2273_s25 = sphi %s2391_s25, %s2844_s25   ;;  %s2269_s24 = sphi %s2389_s24, %s2843_s24   ;;  %s2265_s23 = sphi %s2387_s23, %s2842_s23   ;;  %s2261_s22 = sphi %s2385_s22, %s2841_s22   ;;  %s2257_s21 = sphi %s2383_s21, %s2840_s21  }
   0xf   : > { %2800 = sst [smem:[#allocation7_spill]] %s2261_s22  ;;  %s1882_s30 = sadd.s32 4294967294, %s2285_s28  }
  0x10   : > { %2801 = sst [smem:[#allocation8_spill]] %s2265_s23  ;;  %s38_s0 = sadd.s32 1, %s2277_s26 }
  0x11   : > { %2802 = sst [smem:[#allocation9_spill]] %s2269_s24  ;;  %p39_p0 = scmp.ge.s32.totalorder %s38_s0, 2 }
  0x12   : > { %2803 = sst [smem:[#allocation10_spill]] %s2273_s25  ;;  %s41_s17 = sadd.s32 1, %s2281_s27 }
  0x13   : > { %2804 = sst [smem:[#allocation11_spill]] %s2277_s26  ;;  %p464_p1 = scmp.ne.s32.totalorder %s2265_s23, %s2261_s22 }
  0x14   : > { %2805 = sst [smem:[#allocation12_spill]] %s2281_s27  ;;  %p465_p2 = scmp.eq.s32.totalorder %s1881_s29, 3 }
  0x15   : > { %2806 = sst [smem:[#allocation13_spill]] %s2285_s28  ;;  %s2848_s0 = smov (%p39_p0, %s38_s0), 0 }
  0x16   : > { %2807 = sst [smem:[#allocation14_spill]] %s2848_s0  ;;  %s2850_s17 = smov (!%p39_p0, %s41_s17), %s2281_s27 }
  0x17   : > { %p2432_p3 = por %p465_p2, %p464_p1  ;;  %p470_p4 = scmp.ne.s32.totalorder %s2261_s22, %s2257_s21 }
  0x18   : > { %p43_p5 = scmp.ge.s32.totalorder %s2850_s17, 2  ;;  %p471_p6 = scmp.eq.s32.totalorder %s1882_s30, 3 }
  0x19   : > { %s2808_s18 = scalar_select %p2432_p3, 1, 0 }
  0x1a   : > { %p1885_p7 = scmp.ge.s32.totalorder %s2285_s28, 1  ;;  %p589_p8 = scmp.lt.s32.totalorder %s2285_s28, 5 }
  0x1b   : > { %2809 = sst [smem:[#allocation15_spill]] %s2808_s18  ;;  %s2852_s17 = smov (%p43_p5, %s2850_s17), 0 }
  0x1c   : > { %2810 = sst [smem:[#allocation16_spill]] %s2852_s17  ;;  %p2442_p9 = por %p471_p6, %p470_p4 }
  0x1d   : > { %p590_p10 = pnand %p1885_p7, %p589_p8  ;;  %s451_s20 = ssub.s32 %s2281_s27, %s2852_s17 }
  0x1e   : > { %s2811_s19 = scalar_select %p2442_p9, 1, 0 }
  0x1f   : > { %s454_s29 = sadd.s32 1, %s2265_s23  ;;  %p452_p11 = scmp.eq.s32.totalorder %s451_s20, 0 }
  0x20   : > { %2812 = sst [smem:[#allocation17_spill]] %s2811_s19  ;;  %593 = sbr.rel (%p590_p10) target bundleno = 3045 (0xbe5), region = 84 }
  0x21   : > { %s2450_s0 = scalar_select %p452_p11, %s2265_s23, %s454_s29  }
  0x23   : > { %2813 = sst [smem:[#allocation18_spill]] %s2450_s0 }
  0x27   : > { %s2780_s30 = sand.u32 1, %s2261_s22   ;;  %p686_p12 = scmp.lt.s32.totalorder %s2273_s25, 1 }
  0x28   : > { %s2456_s26 = sshll.u32 %s2780_s30, 3  ;;  %p694_p13 = scmp.lt.s32.totalorder %s2269_s24, 1 }
  0x29   : > { %s687_s19 = scalar_select %p686_p12, %s2273_s25, 1 }
  0x2a   : > { %s2461_s21 = scalar_select %p694_p13, %s2269_s24, 1 }
  0x2b   : > { %s1887_s20 = sshll.u32 %s687_s19, 3  ;;  %s2814_s27 = sld [smem:[#allocation20_spill]] }
  0x2c   : > { %s2815_s1 = sld [smem:[#allocation21_spill]]  ;;  %s1938_s19 = sshll.u32 %s2461_s21, 4 }
  0x2d   : > { %s2816_s4 = sld [smem:[#allocation22_spill]]  ;;  %s2817_s6 = sld [smem:[#allocation23_spill]] }
  0x2e   : > { %s2819_s22 = sld [smem:[#allocation24_spill]]  ;;  %s685_s24 = scalar_lea.vmem [#allocation3], %s2456_s26 }
  0x2f   : > { %s2820_s17 = sld [smem:[#allocation9_spill]] }
  0x31   : > { %s689_s30 = scalar_lea.vmem %s2814_s27, %s1887_s20 }
  0x32   : > { %s2469_s28 = scalar_lea.vmem %s2815_s1, %s1887_s20 }
  0x33   : > { %s2487_s23 = scalar_lea.vmem %s2816_s4, %s1938_s19  ;;  %s2492_s1 = scalar_lea.vmem %s2817_s6, %s1938_s19 }
  0x34   : > { %2818 = sst [smem:[#allocation19_spill]] %s2492_s1  ;;  %s2509_s4 = scalar_lea.vmem %s2768_s10, %s1938_s19 }
  0x35   : > { %s729_s6 = scalar_lea.vmem %s2769_s11, %s2461_s21  ;;  %s1941_s1 = sshll.u32 %s2461_s21, 6 }
  0x36   : > { %s2519_s15 = scalar_lea.vmem %s2770_s12, %s1941_s1  ;;  %s737_s13 = scalar_lea.vmem %s2819_s22, %s2461_s21 }
  0x37   : > { %p1897_p0 = scmp.ne.s32.totalorder %s2820_s17, 0 }
  0x38   : > { %v743_v0 = vld [vmem:[%s689_s30] sm:$0xff] (!%p1897_p0)  ;;  %vm744_vm0 = vcmask (!%p1897_p0), 261120  }
  0x39   : > { %742 = sbr.rel (%p1897_p0) target bundleno = 64 (0x40), region = 88  ;;  %745 = vst.msk [vmem:[#allocation2] sm:$0xff] (!%p1897_p0), %vm744_vm0, %v743_v0 }
  0x40 PF: > { %v2527_v1 = vld [vmem:[#allocation2] sm:$0xff]  ;;  %vm750_vm1 = vcmask 261120   ;;  %v2287_v9 = vmov 0.0   ;;  %vm2288_vm2 = vmmov 0   ;;  %v2150_v10 = vld [vmem:[%s2487_s23 + $0x8] sm:$0xff]   ;;  %s2821_s30 = scalar_lea.vmem %s2760_s2, %s2461_s21  ;;  %s2823_s0 = scalar_lea.vmem %s2763_s5, %s2461_s21  ;;  %vm886_vm5 = vcmask 64512  }
  0x41   : > { %v751_v2 = vsel %vm750_vm1, %v2527_v1, 0.0  ;;  %v2149_v8 = vld [vmem:[%s2487_s23] sm:$0xff]   ;;  %1976 = vmatprep.subr.bf16.mxu0 %v2287_v9  ;;  %1980 = vmatprep.mubr.msk.bf16.mxu0 %vm2288_vm2, %v2287_v9  ;;  %s2822_s23 = scalar_lea.vmem %s2761_s3, %s2461_s21  ;;  %s2289_s20 = smov 104   ;;  %vm1133_vm6 = vcmask 1043456   ;;  %vm1334_vm7 = vcmask 130048   ;;  %vm1336_vm8 = vcmask 195584  }
  0x42   : > { %752 = vadd.xlane.f32.xlu0 %v751_v2  ;;  %1977 = vmatpush3.bf16.msra.mxu0 %v2149_v8  ;;  %v1898_v19 = vld [vmem:[%s2821_s30] ss:$0 sm:$0xff]  ;;  %s2290_s16 = smov 120   ;;  %s2291_s18 = smov 112  }
  0x43   : > { %1996 = vmatprep.subr.bf16.mxu1 %v2287_v9  ;;  %1978 = vmatprep.subr.bf16.mxu0 %v2287_v9  ;;  %v1899_v22 = vld [vmem:[%s2822_s23] ss:$0 sm:$0xff]  ;;  %s2292_s14 = smov 96   ;;  %s2824_s25 = sld [smem:[#allocation19_spill]] }
  0x44   : > { %1998 = vmatprep.mubr.msk.bf16.mxu1 %vm2288_vm2, %v2287_v9  ;;  %v1900_v26 = vld [vmem:[%s2823_s0] ss:$0 sm:$0xff]  ;;  %s2294_s1 = smov 8   ;;  %s2295_s22 = smov 16  }
  0x45   : > { %v747_v55 = vld [vmem:[%s2469_s28] sm:$0xff]  ;;  %s2293_s28 = smov 64   ;;  %s2296_s30 = smov 24  }
  0x46   : > { %1979 = vmatpush3.bf16.msra.mxu0 %v2150_v10  ;;  %s2825_s23 = scalar_lea.vmem %s2765_s7, %s2461_s21  ;;  %s2826_s29 = scalar_lea.vmem %s2766_s8, %s2461_s21 }
  0x47   : > { %1984 = vmatprep.subr.bf16.mxu0 %v2287_v9 }
  0xcf   : > { %v753_v3 = vpop.xlane.xlu0 %752 }
  0xd0   : > { %v755_v4 = vmul.f32 0.03125, %v753_v3 }
  0xd2   : > { %v756_v5 = vsub.f32 %v2527_v1, %v755_v4 }
  0xd4   : > { %v757_v6 = vmul.f32 %v756_v5, %v756_v5  ;;  %v778_v20 = vmul.f32 %v1898_v19, %v756_v5 }
  0xd6   : > { %v758_v7 = vsel %vm750_vm1, %v757_v6, 0.0 }
  0xd7   : > { %759 = vadd.xlane.f32.xlu0 %v758_v7 }
 0x164   : > { %v760_v11 = vpop.xlane.xlu0 %759 }
 0x165   : > { %v762_v12 = vmul.f32 0.032258064, %v760_v11 }
 0x167   : > { %2163 = vrsqrt.f32 %v762_v12  ;;  %vm765_vm3 = vcmp.eq.f32.partialorder %v762_v12, inf  ;;  %v768_v15 = vand.u32 2147483648, %v762_v12  ;;  %vm767_vm4 = vcmp.eq.f32.partialorder %v762_v12, 0.0 }
 0x171   : > { %v2164_v13 = vpop.eup %2163 }
 0x172   : > { %v764_v14 = vmul.f32 %v2164_v13, %v762_v12 }
 0x174   : > { %v766_v16 = vsel %vm765_vm3, %v762_v12, %v764_v14 }
 0x175   : > { %v769_v17 = vsel %vm767_vm4, %v768_v15, %v766_v16 }
 0x176   : > { %v770_v18 = vadd.f32 1e-06, %v769_v17 }
 0x178   : > { %2165 = vrcp.f32 %v770_v18 }
 0x182   : > { %v2166_v21 = vpop.eup %2165 }
 0x183   : > { %v779_v23 = vmul.f32 %v2166_v21, %v778_v20 }
 0x185   : > { %v786_v24 = vadd.f32 %v1899_v22, %v779_v23 }
 0x187   : > { %v787_v25 = vpack.c.bf16 %v786_v24, %v786_v24 }
 0x189   : > { %1981 = vmatmul.mubr.msk.bf16.vlgmr.msra.gmra.mrb[0].mxu0 %vm750_vm1, %v787_v25 }
 0x18a   : > { %1986 = vmatprep.mubr.msk.bf16.mxu0 %vm2288_vm2, %v2287_v9 }
 0x25c   : > { %v848_v27 = vpop.f32.mrb[0].mxu0 }
 0x25d   : > { %v849_v28 = vadd.f32 %v1900_v26, %v848_v27  ;;  %v1982_v29 = vpop.f32.mrb[1].mxu0 }
 0x25e   : > { %v851_v30 = vpop.f32.mrb[2].mxu0 }
 0x25f   : > { %876 = vrot.lane.b32.xlu0 %v849_v28, %s2289_s20  ;;  %870 = vrot.lane.b32.xlu1 %v849_v28, %s2290_s16  ;;  %v1983_v31 = vpop.f32.mrb[3].mxu0  ;;  %v854_v32 = vmul.f32 0.35355338, %v849_v28  ;;  %v2561_v33 = vpack.c.bf16 %v849_v28, %v849_v28 }
 0x261   : > { %v865_v42 = vpack.c.bf16 %v854_v32, %v854_v32 }
 0x263   : > { %873 = vrot.lane.b32.xlu1 %v849_v28, %s2291_s18  ;;  %862 = vrot.lane.b32.xlu0 %v854_v32, %s2289_s20 }
 0x267   : > { %884 = vrot.lane.b32.xlu1 %v2561_v33, %s2292_s14 }
 0x26b   : > { %856 = vrot.lane.b32.xlu1 %v854_v32, %s2290_s16  ;;  %s2827_s16 = scalar_lea.vmem %s2767_s9, %s2461_s21 }
 0x2d1   : > { %v871_v34 = vpop.permute.xlu1 %870  ;;  %v877_v38 = vpop.permute.xlu0 %876 }
 0x2d2   : > { %v2564_v35 = vpack.c.bf16 %v871_v34, %v871_v34  ;;  %v2570_v40 = vpack.c.bf16 %v877_v38, %v877_v38 }
 0x2d4   : > { %934 = vrot.lane.b32.xlu1 %v2564_v35, %s2292_s14 }
 0x2d5   : > { %v874_v36 = vpop.permute.xlu1 %873  ;;  %v863_v51 = vpop.permute.xlu0 %862 }
 0x2d6   : > { %v2567_v37 = vpack.c.bf16 %v874_v36, %v874_v36  ;;  %v868_v54 = vpack.c.bf16 %v863_v51, %v863_v51 }
 0x2d8   : > { %983 = vrot.lane.b32.xlu1 %v2567_v37, %s2292_s14 }
 0x2d9   : > { %v885_v39 = vpop.permute.xlu1 %884 }
 0x2da   : > { %v891_v41 = vsel %vm886_vm5, %v885_v39, 0 }
 0x2db   : > { %1985 = vmatpush3.bf16.xpose.msra.mxu0 %v891_v41 }
 0x2dc   : > { %1032 = vrot.lane.b32.xlu1 %v2570_v40, %s2292_s14  ;;  %1990 = vmatprep.subr.bf16.mxu0 %v2287_v9 }
 0x2dd   : > { %v857_v43 = vpop.permute.xlu1 %856 }
 0x2de   : > { %v866_v48 = vpack.c.bf16 %v857_v43, %v857_v43 }
 0x2e0   : > { %859 = vrot.lane.b32.xlu1 %v854_v32, %s2291_s18 }
 0x2e2   : > { %1987 = vmatmul.mubr.msk.bf16.vlgmr.msra.gmra.mrb[4].mxu0 %vm886_vm5, %v865_v42 }
 0x2e3   : > { %1992 = vmatprep.mubr.msk.bf16.mxu0 %vm2288_vm2, %v2287_v9 }
 0x346   : > { %v935_v44 = vpop.permute.xlu1 %934 }
 0x347   : > { %v940_v45 = vsel %vm886_vm5, %v935_v44, 0 }
 0x348   : > { %1991 = vmatpush3.bf16.xpose.msra.mxu0 %v940_v45 }
 0x349   : > { %2002 = vmatprep.subr.bf16.mxu0 %v2287_v9 }
 0x34a   : > { %v984_v46 = vpop.permute.xlu1 %983 }
 0x34b   : > { %v989_v47 = vsel %vm886_vm5, %v984_v46, 0 }
 0x34c   : > { %1997 = vmatpush3.bf16.xpose.msra.mxu1 %v989_v47 }
 0x34d   : > { %2008 = vmatprep.subr.bf16.mxu1 %v2287_v9 }
 0x34e   : > { %v1033_v49 = vpop.permute.xlu1 %1032 }
 0x34f   : > { %v1038_v50 = vsel %vm886_vm5, %v1033_v49, 0  ;;  %1993 = vmatmul.mubr.msk.bf16.vlgmr.msra.gmra.mrb[8].mxu0 %vm886_vm5, %v866_v48 }
 0x350   : > { %2003 = vmatpush3.bf16.xpose.msra.mxu0 %v1038_v50  ;;  %2004 = vmatprep.mubr.msk.bf16.mxu0 %vm2288_vm2, %v2287_v9 }
 0x351   : > { %2014 = vmatprep.subr.bf16.mxu0 %v2287_v9 }
 0x352   : > { %v860_v52 = vpop.permute.xlu1 %859 }
 0x353   : > { %v867_v53 = vpack.c.bf16 %v860_v52, %v860_v52 }
 0x355   : > { %1999 = vmatmul.mubr.msk.bf16.vlgmr.msra.gmra.mrb[0].mxu1 %vm886_vm5, %v867_v53 }
 0x356   : > { %2010 = vmatprep.mubr.msk.bf16.mxu1 %vm2288_vm2, %v2287_v9 }
 0x357   : > { %2005 = vmatmul.mubr.msk.bf16.vlgmr.msra.gmra.mrb[12].mxu0 %vm886_vm5, %v868_v54 }
 0x358   : > { %2016 = vmatprep.mubr.msk.bf16.mxu0 %vm2288_vm2, %v2287_v9 }
 0x3b5   : > { %v927_v56 = vpop.f32.mrb[4].mxu0 }
 0x3b6   : > { %v928_v57 = vadd.f32 %v927_v56, %v747_v55  ;;  %v1988_v58 = vpop.f32.mrb[5].mxu0 }
 0x3b7   : > { %v930_v59 = vpop.f32.mrb[6].mxu0 }
 0x3b8   : > { %v1989_v60 = vpop.f32.mrb[7].mxu0  ;;  %v1080_v61 = vsel %vm886_vm5, %v928_v57, -inf }
 0x3b9   : > { %1081 = vmax.xlane.f32.xlu1 %v1080_v61 }
 0x422   : > { %v976_v62 = vpop.f32.mrb[8].mxu0 }
 0x423   : > { %v977_v63 = vadd.f32 %v976_v62, %v747_v55  ;;  %v1994_v0 = vpop.f32.mrb[9].mxu0 }
 0x424   : > { %v979_v2 = vpop.f32.mrb[10].mxu0 }
 0x425   : > { %v1995_v3 = vpop.f32.mrb[11].mxu0  ;;  %v1083_v4 = vsel %vm886_vm5, %v977_v63, -inf }
 0x426   : > { %1084 = vmax.xlane.f32.xlu0 %v1083_v4  ;;  %v2151_v3 = vld [vmem:[%s2824_s25] sm:$0xff]   ;;  %v2152_v4 = vld [vmem:[%s2824_s25 + $0x8] sm:$0xff]  }
 0x428   : > { %v1025_v5 = vpop.f32.mrb[0].mxu1 }
 0x429   : > { %v1026_v6 = vadd.f32 %v1025_v5, %v747_v55  ;;  %v2000_v7 = vpop.f32.mrb[1].mxu1 }
 0x42a   : > { %v1028_v8 = vpop.f32.mrb[2].mxu1  ;;  %v1074_v10 = vpop.f32.mrb[12].mxu0 }
 0x42b   : > { %v1075_v11 = vadd.f32 %v1074_v10, %v747_v55  ;;  %v2001_v12 = vpop.f32.mrb[3].mxu1  ;;  %v2006_v13 = vpop.f32.mrb[13].mxu0  ;;  %v1086_v14 = vsel %vm886_vm5, %v1026_v6, -inf }
 0x42c   : > { %1087 = vmax.xlane.f32.xlu0 %v1086_v14  ;;  %v1077_v15 = vpop.f32.mrb[14].mxu0 }
 0x42d   : > { %v2007_v16 = vpop.f32.mrb[15].mxu0  ;;  %v1089_v17 = vsel %vm886_vm5, %v1075_v11, -inf }
 0x42e   : > { %1090 = vmax.xlane.f32.xlu1 %v1089_v17 }
 0x43f   : > { %1177 = vrot.lane.b32.xlu1 %v2564_v35, %s2293_s28 }
 0x442   : > { %1128 = vrot.lane.b32.xlu0 %v2561_v33, %s2293_s28 }
 0x446   : > { %v1082_v18 = vpop.xlane.xlu1 %1081 }
 0x447   : > { %v1092_v19 = vsub.f32 %v928_v57, %v1082_v18 }
 0x449   : > { %v1096_v20 = vmul.f32 1.442695, %v1092_v19 }
 0x44b   : > { %2167 = vpow2.f32 %v1096_v20 }
 0x455   : > { %v2168_v21 = vpop.eup %2167 }
 0x456   : > { %v1104_v22 = vsel %vm886_vm5, %v2168_v21, 0.0 }
 0x461   : > { %1105 = vadd.xlane.f32.xlu0 %v1104_v22 }
 0x4b3   : > { %v1085_v23 = vpop.xlane.xlu0 %1084 }
 0x4b4   : > { %v1093_v24 = vsub.f32 %v977_v63, %v1085_v23 }
 0x4b6   : > { %v1098_v25 = vmul.f32 1.442695, %v1093_v24 }
 0x4b8   : > { %2169 = vpow2.f32 %v1098_v25  ;;  %v1912_v25 = vld [vmem:[%s2825_s23] ss:$0 sm:$0xff] }
 0x4b9   : > { %v1088_v26 = vpop.xlane.xlu0 %1087 }
 0x4ba   : > { %v1094_v27 = vsub.f32 %v1026_v6, %v1088_v26 }
 0x4bb   : > { %v1091_v28 = vpop.xlane.xlu1 %1090 }
 0x4bc   : > { %v1100_v29 = vmul.f32 1.442695, %v1094_v27  ;;  %v1095_v30 = vsub.f32 %v1075_v11, %v1091_v28 }
 0x4bd   : > { %v1129_v31 = vpop.permute.xlu0 %1128 }
 0x4be   : > { %2171 = vpow2.f32 %v1100_v29  ;;  %v1102_v32 = vmul.f32 1.442695, %v1095_v30  ;;  %v1135_v33 = vsel %vm1133_vm6, %v1129_v31, 0 }
 0x4bf   : > { %2009 = vmatpush3.bf16.msra.mxu1 %v1135_v33  ;;  %v1178_v34 = vpop.permute.xlu1 %1177 }
 0x4c0   : > { %2173 = vpow2.f32 %v1102_v32  ;;  %v1183_v35 = vsel %vm1133_vm6, %v1178_v34, 0  ;;  %2020 = vmatprep.subr.bf16.mxu1 %v2287_v9 }
 0x4c1   : > { %2015 = vmatpush3.bf16.msra.mxu0 %v1183_v35 }
 0x4c2   : > { %v2170_v36 = vpop.eup %2169  ;;  %2026 = vmatprep.subr.bf16.mxu0 %v2287_v9 }
 0x4c3   : > { %v1107_v38 = vsel %vm886_vm5, %v2170_v36, 0.0 }
 0x4c4   : > { %1108 = vadd.xlane.f32.xlu1 %v1107_v38 }
 0x4c8   : > { %v2172_v39 = vpop.eup %2171 }
 0x4c9   : > { %v1110_v41 = vsel %vm886_vm5, %v2172_v39, 0.0 }
 0x4ca   : > { %v2174_v42 = vpop.eup %2173  ;;  %1111 = vadd.xlane.f32.xlu0 %v1110_v41  ;;  %v2155_v41 = vld [vmem:[%s2519_s15] sm:$0xff]  }
 0x4cb   : > { %v1113_v43 = vsel %vm886_vm5, %v2174_v42, 0.0 }
 0x4cc   : > { %1114 = vadd.xlane.f32.xlu1 %v1113_v43  ;;  %v2157_v43 = vld [vmem:[%s2519_s15 + $0x10] sm:$0xff]  }
 0x4dd   : > { %1225 = vrot.lane.b32.xlu1 %v2567_v37, %s2293_s28 }
 0x4e0   : > { %1273 = vrot.lane.b32.xlu0 %v2570_v40, %s2293_s28 }
 0x4ee   : > { %v1106_v44 = vpop.xlane.xlu0 %1105 }
 0x4ef   : > { %2175 = vrcp.f32 %v1106_v44  ;;  %v2158_v44 = vld [vmem:[%s2519_s15 + $0x18] sm:$0xff]  }
 0x4f9   : > { %v2176_v45 = vpop.eup %2175 }
 0x4fa   : > { %v1120_v46 = vmul.f32 %v2176_v45, %v2168_v21  ;;  %v2159_v45 = vld [vmem:[%s2519_s15 + $0x20] sm:$0xff]  }
 0x4fc   : > { %v1124_v47 = vpack.c.bf16 %v1120_v46, %v1120_v46  ;;  %v2160_v46 = vld [vmem:[%s2519_s15 + $0x28] sm:$0xff]  }
 0x4fe   : > { %2011 = vmatmul.mubr.msk.bf16.vlgmr.msra.gmra.mrb[4].mxu1 %vm886_vm5, %v1124_v47 }
 0x4ff   : > { %2022 = vmatprep.mubr.msk.bf16.mxu1 %vm2288_vm2, %v2287_v9 }
 0x551   : > { %v1109_v48 = vpop.xlane.xlu1 %1108 }
 0x552   : > { %2177 = vrcp.f32 %v1109_v48 }
 0x557   : > { %v1112_v49 = vpop.xlane.xlu0 %1111 }
 0x558   : > { %2179 = vrcp.f32 %v1112_v49 }
 0x559   : > { %v1115_v50 = vpop.xlane.xlu1 %1114 }
 0x55a   : > { %2181 = vrcp.f32 %v1115_v50 }
 0x55b   : > { %v1274_v40 = vpop.permute.xlu0 %1273 }
 0x55c   : > { %v2178_v37 = vpop.eup %2177  ;;  %v1279_v55 = vsel %vm1133_vm6, %v1274_v40, 0 }
 0x55d   : > { %v1121_v51 = vmul.f32 %v2178_v37, %v2170_v36  ;;  %v1226_v52 = vpop.permute.xlu1 %1225 }
 0x55e   : > { %v1231_v53 = vsel %vm1133_vm6, %v1226_v52, 0 }
 0x55f   : > { %2021 = vmatpush3.bf16.msra.mxu1 %v1231_v53  ;;  %v1125_v54 = vpack.c.bf16 %v1121_v51, %v1121_v51  ;;  %v1916_v53 = vld [vmem:[%s2826_s29] ss:$0 sm:$0xff] }
 0x560   : > { %2032 = vmatprep.subr.bf16.mxu1 %v2287_v9 }
 0x561   : > { %2017 = vmatmul.mubr.msk.bf16.vlgmr.msra.gmra.mrb[16].mxu0 %vm886_vm5, %v1125_v54 }
 0x562   : > { %v2180_v56 = vpop.eup %2179  ;;  %2027 = vmatpush3.bf16.msra.mxu0 %v1279_v55  ;;  %2028 = vmatprep.mubr.msk.bf16.mxu0 %vm2288_vm2, %v2287_v9 }
 0x563   : > { %v1122_v57 = vmul.f32 %v2180_v56, %v2172_v39  ;;  %2040 = vmatprep.subr.bf16.mxu0 %v2287_v9  ;;  %v2153_v39 = vld [vmem:[%s2509_s4] sm:$0xff]  }
 0x564   : > { %v2182_v58 = vpop.eup %2181  ;;  %v1917_v56 = vld [vmem:[%s2827_s16] ss:$0 sm:$0xff] }
 0x565   : > { %v1123_v59 = vmul.f32 %v2182_v58, %v2174_v42  ;;  %v1126_v60 = vpack.c.bf16 %v1122_v57, %v1122_v57  ;;  %v2156_v42 = vld [vmem:[%s2519_s15 + $0x8] sm:$0xff]  }
 0x567   : > { %2023 = vmatmul.mubr.msk.bf16.vlgmr.msra.gmra.mrb[8].mxu1 %vm886_vm5, %v1126_v60  ;;  %v1127_v61 = vpack.c.bf16 %v1123_v59, %v1123_v59  ;;  %v2161_v60 = vld [vmem:[%s2519_s15 + $0x30] sm:$0xff]  }
 0x568   : > { %2036 = vmatprep.mubr.msk.bf16.mxu1 %vm2288_vm2, %v2287_v9  ;;  %2033 = vmatpush3.bf16.msra.mxu1 %v2151_v3 }
 0x569   : > { %2029 = vmatmul.mubr.msk.bf16.vlgmr.msra.gmra.mrb[20].mxu0 %vm886_vm5, %v1127_v61  ;;  %2034 = vmatprep.subr.bf16.mxu1 %v2287_v9  ;;  %v2162_v61 = vld [vmem:[%s2519_s15 + $0x38] sm:$0xff]  }
 0x56a   : > { %2044 = vmatprep.mubr.msk.bf16.mxu0 %vm2288_vm2, %v2287_v9  ;;  %2041 = vmatpush3.bf16.msra.mxu0 %v2153_v39 }
 0x56b   : > { %2042 = vmatprep.subr.bf16.mxu0 %v2287_v9 }
 0x56c   : > { %2035 = vmatpush3.bf16.msra.mxu1 %v2152_v4 }
 0x56d   : > { %2048 = vmatprep.subr.bf16.mxu1 %v2287_v9 }
 0x5d1   : > { %v1171_v62 = vpop.f32.mrb[4].mxu1 }
 0x5d2   : > { %v2012_v63 = vpop.f32.mrb[5].mxu1 }
 0x5d3   : > { %v1174_v0 = vpop.f32.mrb[6].mxu1 }
 0x5d4   : > { %v2013_v2 = vpop.f32.mrb[7].mxu1 }
 0x634   : > { %v1219_v5 = vpop.f32.mrb[16].mxu0 }
 0x635   : > { %1322 = vrot.lane.b32.xlu1 %v1219_v5, %s2294_s1  ;;  %v2018_v6 = vpop.f32.mrb[17].mxu0 }
 0x636   : > { %v1222_v7 = vpop.f32.mrb[18].mxu0 }
 0x637   : > { %v2019_v8 = vpop.f32.mrb[19].mxu0 }
 0x63a   : > { %v1267_v10 = vpop.f32.mrb[8].mxu1 }
 0x63b   : > { %1326 = vrot.lane.b32.xlu0 %v1267_v10, %s2295_s22  ;;  %v2024_v11 = vpop.f32.mrb[9].mxu1 }
 0x63c   : > { %v1270_v12 = vpop.f32.mrb[10].mxu1  ;;  %v1315_v13 = vpop.f32.mrb[20].mxu0 }
 0x63d   : > { %v2025_v14 = vpop.f32.mrb[11].mxu1  ;;  %1330 = vrot.lane.b32.xlu1 %v1315_v13, %s2296_s30  ;;  %v2030_v15 = vpop.f32.mrb[21].mxu0 }
 0x63e   : > { %v1318_v16 = vpop.f32.mrb[22].mxu0 }
 0x63f   : > { %v2031_v17 = vpop.f32.mrb[23].mxu0 }
 0x6a7   : > { %v1323_v18 = vpop.permute.xlu1 %1322 }
 0x6a8   : > { %v1333_v19 = vsel %vm886_vm5, %v1171_v62, %v1323_v18  ;;  %v1918_v62 = vld [vmem:[%s729_s6] ss:$0 sm:$0xff]  ;;  %s2829_s6 = sld [smem:[#allocation9_spill]] }
 0x6ad   : > { %v1327_v20 = vpop.permute.xlu0 %1326 }
 0x6ae   : > { %v1335_v21 = vsel %vm1334_vm7, %v1333_v19, %v1327_v20  ;;  %p1931_p1 = scmp.ne.s32.totalorder %s2829_s6, 1 }
 0x6af   : > { %v1331_v22 = vpop.permute.xlu1 %1330  ;;  %s2831_s19 = sld [smem:[#allocation26_spill]] (!%p1931_p1) }
 0x6b0   : > { %v1337_v23 = vsel %vm1336_vm8, %v1335_v21, %v1331_v22 }
 0x6b1   : > { %v1338_v24 = vpack.c.bf16 %v1337_v23, %v1337_v23 }
 0x6b3   : > { %2037 = vmatmul.mubr.msk.bf16.vlgmr.msra.gmra.mrb[12].mxu1 %vm750_vm1, %v1338_v24 }
 0x6b4   : > { %2064 = vmatprep.mubr.msk.bf16.mxu1 %vm2288_vm2, %v2287_v9  ;;  %2049 = vmatpush3.bf16.msra.mxu1 %v2155_v41 }
 0x6b5   : > { %2050 = vmatprep.subr.bf16.mxu1 %v2287_v9 }
 0x6b8   : > { %2051 = vmatpush3.bf16.msra.mxu1 %v2156_v42 }
 0x6b9   : > { %2052 = vmatprep.subr.bf16.mxu1 %v2287_v9 }
 0x6bc   : > { %2053 = vmatpush3.bf16.msra.mxu1 %v2157_v43 }
 0x6bd   : > { %2054 = vmatprep.subr.bf16.mxu1 %v2287_v9 }
 0x6c0   : > { %2055 = vmatpush3.bf16.msra.mxu1 %v2158_v44 }
 0x6c1   : > { %2056 = vmatprep.subr.bf16.mxu1 %v2287_v9 }
 0x6c4   : > { %2057 = vmatpush3.bf16.msra.mxu1 %v2159_v45 }
 0x6c5   : > { %2058 = vmatprep.subr.bf16.mxu1 %v2287_v9 }
 0x6c8   : > { %2059 = vmatpush3.bf16.msra.mxu1 %v2160_v46 }
 0x6c9   : > { %2060 = vmatprep.subr.bf16.mxu1 %v2287_v9 }
 0x6cc   : > { %2061 = vmatpush3.bf16.msra.mxu1 %v2161_v60 }
 0x6cd   : > { %2062 = vmatprep.subr.bf16.mxu1 %v2287_v9  ;;  %v1922_v9 = vld [vmem:[%s737_s13] ss:$0 sm:$0xff]  ;;  %s2830_s13 = sld [smem:[#allocation25_spill]] (!%p1931_p1) }
 0x6d0   : > { %2063 = vmatpush3.bf16.msra.mxu1 %v2162_v61 }
 0x786   : > { %v1399_v26 = vpop.f32.mrb[12].mxu1 }
 0x787   : > { %v1400_v27 = vadd.f32 %v1912_v25, %v1399_v26  ;;  %v2038_v28 = vpop.f32.mrb[13].mxu1 }
 0x788   : > { %v1402_v29 = vpop.f32.mrb[14].mxu1  ;;  %v1932_v28 = vld [vmem:[%s2830_s13] ss:$0 sm:$0xff] (!%p1931_p1) }
 0x789   : > { %v2644_v30 = vadd.f32 %v1400_v27, %v2527_v1  ;;  %v2039_v31 = vpop.f32.mrb[15].mxu1  ;;  %v2154_v1 = vld [vmem:[%s2509_s4 + $0x8] sm:$0xff]  }
 0x78a   : > { %2043 = vmatpush3.bf16.msra.mxu0 %v2154_v1  ;;  %v1933_v31 = vld [vmem:[%s2831_s19] ss:$0 sm:$0xff] (!%p1931_p1) }
 0x78b   : > { %v1408_v32 = vsel %vm750_vm1, %v2644_v30, 0.0 }
 0x78c   : > { %1409 = vadd.xlane.f32.xlu0 %v1408_v32 }
 0x819   : > { %v1410_v33 = vpop.xlane.xlu0 %1409 }
 0x81a   : > { %v1411_v34 = vmul.f32 0.03125, %v1410_v33 }
 0x81c   : > { %v1412_v35 = vsub.f32 %v2644_v30, %v1411_v34 }
 0x81e   : > { %v1413_v36 = vmul.f32 %v1412_v35, %v1412_v35  ;;  %v1433_v54 = vmul.f32 %v1916_v53, %v1412_v35 }
 0x820   : > { %v1414_v38 = vsel %vm750_vm1, %v1413_v36, 0.0 }
 0x821   : > { %1415 = vadd.xlane.f32.xlu1 %v1414_v38 }
 0x8ae   : > { %v1416_v47 = vpop.xlane.xlu1 %1415 }
 0x8af   : > { %v1417_v48 = vmul.f32 0.032258064, %v1416_v47 }
 0x8b1   : > { %2183 = vrsqrt.f32 %v1417_v48  ;;  %vm1420_vm9 = vcmp.eq.f32.partialorder %v1417_v48, inf  ;;  %v1423_v37 = vand.u32 2147483648, %v1417_v48  ;;  %vm1422_vm10 = vcmp.eq.f32.partialorder %v1417_v48, 0.0 }
 0x8bb   : > { %v2184_v49 = vpop.eup %2183 }
 0x8bc   : > { %v1419_v50 = vmul.f32 %v2184_v49, %v1417_v48 }
 0x8be   : > { %v1421_v51 = vsel %vm1420_vm9, %v1417_v48, %v1419_v50 }
 0x8bf   : > { %v1424_v52 = vsel %vm1422_vm10, %v1423_v37, %v1421_v51 }
 0x8c0   : > { %v1425_v40 = vadd.f32 1e-06, %v1424_v52 }
 0x8c2   : > { %2185 = vrcp.f32 %v1425_v40 }
 0x8cc   : > { %v2186_v55 = vpop.eup %2185 }
 0x8cd   : > { %v1434_v57 = vmul.f32 %v2186_v55, %v1433_v54 }
 0x8cf   : > { %v1441_v58 = vadd.f32 %v1917_v56, %v1434_v57 }
 0x8d1   : > { %v1442_v59 = vpack.c.bf16 %v1441_v58, %v1441_v58 }
 0x8d3   : > { %2045 = vmatmul.mubr.msk.bf16.vlgmr.msra.gmra.mrb[24].mxu0 %vm750_vm1, %v1442_v59 }
 0x9a6   : > { %v1503_v63 = vpop.f32.mrb[24].mxu0 }
 0x9a7   : > { %v1504_v0 = vadd.f32 %v1918_v62, %v1503_v63  ;;  %v2046_v2 = vpop.f32.mrb[25].mxu0 }
 0x9a8   : > { %v1506_v3 = vpop.f32.mrb[26].mxu0 }
 0x9a9   : > { %v1509_v4 = vmax.f32 %v1504_v0, 0.0  ;;  %v2047_v5 = vpop.f32.mrb[27].mxu0 }
 0x9ab   : > { %v1510_v6 = vpack.c.bf16 %v1509_v4, %v1509_v4 }
 0x9ad   : > { %2065 = vmatmul.mubr.bf16.vlgmr.msra.gmra.mrb[16].mxu1 %v1510_v6 }
 0xa7f   : > { %1627 = sbr.rel (%p1931_p1) target bundleno = 3020 (0xbcc), region = 92 }
 0xa80   : > { %v1616_v7 = vpop.f32.mrb[16].mxu1 }
 0xa81   : > { %v1617_v8 = vadd.f32 %v1922_v9, %v1616_v7  ;;  %v2066_v10 = vpop.f32.mrb[17].mxu1 }
 0xa82   : > { %v1619_v11 = vpop.f32.mrb[18].mxu1 }
 0xa83   : > { %v1622_v12 = vadd.f32 %v1617_v8, %v2644_v30  ;;  %v2067_v13 = vpop.f32.mrb[19].mxu1 }
 0xa85   : > { %1623 = vst.msk [vmem:[#allocation2] sm:$0xff] %vm750_vm1, %v1622_v12  ;;  %v1630_v14 = vsel (!%p1931_p1), %vm750_vm1, %v1622_v12, 0.0 }
 0xa86   : > { %1631 = vadd.xlane.f32.xlu0 %v1630_v14 }
 0xb13   : > { %v1632_v15 = vpop.xlane.xlu0 %1631 }
 0xb14   : > { %v1633_v16 = vmul.f32 0.03125, %v1632_v15 }
 0xb16   : > { %v1634_v17 = vsub.f32 %v1622_v12, %v1633_v16 }
 0xb18   : > { %v1635_v18 = vmul.f32 %v1634_v17, %v1634_v17  ;;  %v1655_v29 = vmul.f32 %v1932_v28, %v1634_v17 }
 0xb1a   : > { %v1636_v19 = vsel %vm750_vm1, %v1635_v18, 0.0 }
 0xb1b   : > { %1637 = vadd.xlane.f32.xlu0 %v1636_v19 }
 0xba8   : > { %v1638_v20 = vpop.xlane.xlu0 %1637 }
 0xba9   : > { %v1639_v21 = vmul.f32 0.032258064, %v1638_v20 }
 0xbab   : > { %2187 = vrsqrt.f32 %v1639_v21  ;;  %vm1642_vm11 = vcmp.eq.f32.partialorder %v1639_v21, inf  ;;  %v1645_v24 = vand.u32 2147483648, %v1639_v21  ;;  %vm1644_vm12 = vcmp.eq.f32.partialorder %v1639_v21, 0.0 }
 0xbb5   : > { %v2188_v22 = vpop.eup %2187 }
 0xbb6   : > { %v1641_v23 = vmul.f32 %v2188_v22, %v1639_v21 }
 0xbb8   : > { %v1643_v25 = vsel %vm1642_vm11, %v1639_v21, %v1641_v23 }
 0xbb9   : > { %v1646_v26 = vsel %vm1644_vm12, %v1645_v24, %v1643_v25 }
 0xbba   : > { %v1647_v27 = vadd.f32 1e-06, %v1646_v26 }
 0xbbc   : > { %2189 = vrcp.f32 %v1647_v27 }
 0xbc6   : > { %v2190_v30 = vpop.eup %2189 }
 0xbc7   : > { %v1656_v32 = vmul.f32 %v2190_v30, %v1655_v29 }
 0xbc9   : > { %v1663_v33 = vadd.f32 %v1933_v31, %v1656_v32 }
 0xbcb   : > { %1664 = vst.msk [vmem:[%s685_s24] sm:$0xff] %vm750_vm1, %v1663_v33 }
 0xbcc PF: > { %s2832_s17 = sld [smem:[#allocation10_spill]]  ;;  %s2833_s23 = sld [smem:[#allocation7_spill]] }
 0xbcd   : > { %s2835_s20 = sld [smem:[#allocation27_spill]]  ;;  %s1679_s18 = sshll.u32 %s685_s24, 4  ;;  %s1680_s18 = int_to_ptr.vmem [resolvable:$true] %s1679_s18 }
 0xbce   : > { %s2191_s25 = scalar_lea.vmem %s1680_s18, 128  ;;  %s2297_s1 = smov [#allocation3]  }
 0xbcf   : > { %p2192_p2 = scmp.ne.s32.totalorder %s1680_s18, %s2191_s25  ;;  %s2195_s6 = sshll.u32 %s2297_s1, 4  ;;  %s2196_s6 = int_to_ptr.vmem [resolvable:$false] %s2195_s6 }
 0xbd0   : > { %s2197_s21 = scalar_lea.vmem %s2196_s6, 256  ;;  %p2198_p6 = scmp.lt.s32.totalorder %s1680_s18, %s2196_s6 }
 0xbd1   : > { %p2193_p4 = pnand %p2192_p2, %p2432_p3  ;;  %p2199_p7 = scmp.lt.s32.totalorder %s2197_s21, %s2191_s25 }
 0xbd2   : > { %s1935_s27 = sshll.u32 %s2832_s17, 7  ;;  %s2836_s14 = sand.u32 1, %s2833_s23  }
 0xbd3   : > { %s2707_s16 = scalar_lea.hbm %s2835_s20, %s1935_s27  ;;  %s1666_s28 = scalar_lea.sflag [#allocation4], %s2836_s14 }
 0xbd4   : > { %p2194_p5 = pneg %p2193_p4  ;;  %p2200_p8 = por %p2199_p7, %p2198_p6 }
 0xbd6   : > { %p2201_p10 = pnand %p2200_p8, %p2194_p5 }
 0xbd8   : > { %2204 = shalt.err (!%p2201_p10)
}
 0xbd9   : > { %s2205_s26 = scalar_lea.hbm %s2707_s16, 128  ;;  %s2209_s13 = scalar_lea.hbm %s2835_s20, 256 }
 0xbda   : > { %p2206_p11 = scmp.ne.s32.totalorder %s2707_s16, %s2205_s26  ;;  %p2210_p0 = scmp.lt.u32.totalorder %s2707_s16, %s2835_s20 }
 0xbdb   : > { %p2211_p1 = scmp.lt.u32.totalorder %s2209_s13, %s2205_s26  ;;  %p2213_p4 = scmp.lt.u32.totalorder %s2205_s26, %s2707_s16 }
 0xbdc   : > { %p2207_p12 = pnand %p2206_p11, %p2432_p3 }
 0xbdd   : > { %p2212_p2 = por %p2211_p1, %p2210_p0 }
 0xbde   : > { %p2208_p13 = pneg %p2207_p12 }
 0xbdf   : > { %p2214_p5 = por %p2213_p4, %p2212_p2 }
 0xbe1   : > { %p2215_p6 = pnand %p2214_p5, %p2208_p13 }
 0xbe3   : > { %2218 = shalt.err (!%p2215_p6)
}
 0xbe4   : > { %2068 = dma.vmem_to_hbm [thread:$0]  (%p2432_p3), %s1680_s18, 128, %s2707_s16, %s1666_s28  }
 0xbe5 PF: > { %s2837_s19 = sld [smem:[#allocation13_spill]]  ;;  %s2838_s17 = sld [smem:[#allocation6_spill]] }
 0xbeb   : > { %p2074_p7 = scmp.ge.s32.totalorder %s2837_s19, 2  ;;  %s1691_s27 = sand.u32 1, %s2838_s17  }
 0xbec   : > { %s1692_s29 = scalar_lea.sflag [#allocation4], %s1691_s27 }
 0xbed   : > { %p2071_p8 = pnand %p2074_p7, %p2442_p9 }
 0xbef   : > { %2252 = dma.done.wait (!%p2071_p8), %s1692_s29, 128  }
 0xbf0   : > { %2254 = vsyncadd (!%p2071_p8), %s1692_s29, 4294967168  ;;  %s29_s28 = sadd.s32 1, %s2837_s19   ;;  %s2840_s21 = sld [smem:[#allocation7_spill]] }
 0xbf1   : > { %p26_p10 = scmp.ge.s32.totalorder %s29_s28, 6   ;;  %s2841_s22 = sld [smem:[#allocation8_spill]] }
 0xbf2   : > { %s2842_s23 = sld [smem:[#allocation18_spill]]  ;;  %s2843_s24 = sld [smem:[#allocation11_spill]] }
 0xbf3   : > { %s2844_s25 = sld [smem:[#allocation12_spill]]  ;;  %s2845_s26 = sld [smem:[#allocation14_spill]] }
 0xbf4   : > { %s2846_s27 = sld [smem:[#allocation16_spill]]  ;;  %28 = sbr.rel (!%p26_p10) target bundleno = 14 (0xe), region = 166 }
 0xbfb   :  { %1697 = vsyncpa [#allocation4], 1 }
 0xbfc   :  { %1699 = vsyncpa [#allocation4 + $0x1], 1 }

</bundles_post_ra>
